<compile_context>
chip_gen: v5e
topology: v5e:2x2
jax: 0.10.0
libtpu: 0.0.40
codegen_flags: <defaults>
</compile_context>

<pallas_src>
import jax
import jax.numpy as jnp
from jax.experimental import pallas as pl
from jax.experimental.pallas import tpu as pltpu

HIDDEN = 128       # hidden width fixed by the module spec
OUT_PAD = 128      # lane-dense padded output width
NEG_BIG = -1e30    # "minus infinity" bias for padded logit lanes


def _round_up(n, m):
    return ((n + m - 1) // m) * m


def _make_policy_kernel(state_dim, action_dim, w2_row0):
    S, A, H = state_dim, action_dim, HIDDEN
    P0 = w2_row0  # tile-aligned sublane offset of the w2 block inside the slab

    def kernel(p_ref, x_ref, o_ref):
        # p_ref layout (rows, width 128):
        #   [0:S]        w1                         [S, H]
        #   [S]          b1                         [1, H]
        #   [S+1]        b2 padded with NEG_BIG     [1, OUT_PAD]
        #   [S+2:P0]     zero padding (to a multiple of 8 rows)
        #   [P0:P0+H]    w2 zero-padded             [H, OUT_PAD]  (tile aligned)
        tb = x_ref.shape[0]
        x = x_ref[...]                                            # [tb, S] f32

        # ---- Layer 1 (K = state_dim, tiny): VPU broadcast-FMAs, skip the MXU.
        h = jnp.broadcast_to(p_ref[S:S + 1, :], (tb, H))          # b1
        for k in range(S):                                        # S == 4
            h = h + x[:, k:k + 1] * p_ref[k:k + 1, :]
        h = jnp.maximum(h, 0.0)                                   # ReLU

        # ---- Layer 2: full-width MXU matmul against zero-padded w2 ----------
        logits = jnp.dot(h, p_ref[P0:P0 + H, :],
                         preferred_element_type=jnp.float32)
        logits = logits + p_ref[S + 1:S + 2, :]                   # [tb, OUT_PAD]

        if A == 2:
            # 2-way softmax as a sigmoid: no cross-lane reduce; exp on the EUP.
            d = logits[:, 1:2] - logits[:, 0:1]                   # [tb, 1]
            p0 = 1.0 / (1.0 + jnp.exp(d))      # exp(l0) / (exp(l0) + exp(l1))
            p1 = 1.0 - p0
            lane = jax.lax.broadcasted_iota(jnp.int32, (tb, OUT_PAD), 1)
            out = jnp.where(lane == 0, p0, jnp.where(lane == 1, p1, 0.0))
        else:
            # Generic numerically-stable softmax; padded lanes carry a NEG_BIG
            # bias so exp(...) == 0 and they do not perturb the sum.
            m = jnp.max(logits, axis=-1, keepdims=True)
            e = jnp.exp(logits - m)
            out = e / jnp.sum(e, axis=-1, keepdims=True)

        o_ref[...] = out.astype(o_ref.dtype)

    return kernel


def policy_net_forward(x, w1, b1, w2, b2, *, block_b=512):
    """x: [B, state_dim] f32 -> probs: [B, action_dim] f32 (rows sum to 1)."""
    B, S = x.shape
    H, A = w2.shape
    assert w1.shape == (S, H) and H == HIDDEN, "module uses a fixed 128 hidden"
    assert A <= OUT_PAD

    w1 = w1.astype(jnp.float32)
    w2 = w2.astype(jnp.float32)
    b1 = jnp.reshape(b1, (1, H)).astype(jnp.float32)
    b2 = jnp.reshape(b2, (1, A)).astype(jnp.float32)

    # Pack all parameters into one width-128 slab -> a single DMA, VMEM
    # resident across grid steps.  Small params live in the first sublane
    # tile(s); w2 starts at a multiple-of-8 row so its [128,128] view used by
    # the MXU is (8,128)-tile aligned.
    w2_pad = jnp.zeros((H, OUT_PAD), jnp.float32).at[:, :A].set(w2)
    b2_pad = jnp.full((1, OUT_PAD), NEG_BIG, jnp.float32).at[:, :A].set(b2)
    w2_row0 = _round_up(S + 2, 8)
    pad_rows = w2_row0 - (S + 2)
    pieces = [w1, b1, b2_pad]
    if pad_rows:
        pieces.append(jnp.zeros((pad_rows, OUT_PAD), jnp.float32))
    pieces.append(w2_pad)
    slab = jnp.concatenate(pieces, axis=0)                 # [w2_row0 + H, 128]

    # Batch tiling: multiple-of-8 sublane blocks; pad ragged batches.
    if B >= block_b:
        tb = block_b
    else:
        tb = max(8, _round_up(B, 8))
    Bp = pl.cdiv(B, tb) * tb
    x = x.astype(jnp.float32)
    if Bp != B:
        x = jnp.pad(x, ((0, Bp - B), (0, 0)))

    kernel = _make_policy_kernel(S, A, w2_row0)
    out = pl.pallas_call(
        kernel,
        out_shape=jax.ShapeDtypeStruct((Bp, OUT_PAD), jnp.float32),
        grid_spec=pltpu.PrefetchScalarGridSpec(
            num_scalar_prefetch=0,
            grid=(Bp // tb,),
            in_specs=[
                pl.BlockSpec(slab.shape, lambda i: (0, 0)),   # params resident
                pl.BlockSpec((tb, S), lambda i: (i, 0)),      # activation block
            ],
            out_specs=pl.BlockSpec((tb, OUT_PAD), lambda i: (i, 0)),
        ),
        compiler_params=pltpu.CompilerParams(
            dimension_semantics=("parallel",),   # v7x: shard batch over 2 TCs
        ),
    )(slab, x)
    # Lane-dense store inside the kernel; slice to the real action_dim here.
    return out[:B, :A]


def init_params(key, state_dim, action_dim, hidden=HIDDEN):
    """Deterministic init mimicking PyTorch nn.Linear (uniform +/- 1/sqrt(fan_in))."""
    k1, k2, k3, k4 = jax.random.split(key, 4)
    bound1 = 1.0 / jnp.sqrt(jnp.float32(state_dim))
    bound2 = 1.0 / jnp.sqrt(jnp.float32(hidden))
    # Stored as [in, out] (transpose of PyTorch's [out, in]).
    w1 = jax.random.uniform(k1, (state_dim, hidden), jnp.float32, -bound1, bound1)
    b1 = jax.random.uniform(k2, (1, hidden), jnp.float32, -bound1, bound1)
    w2 = jax.random.uniform(k3, (hidden, action_dim), jnp.float32, -bound2, bound2)
    b2 = jax.random.uniform(k4, (1, action_dim), jnp.float32, -bound2, bound2)
    return w1, b1, w2, b2


def reference_forward(x, w1, b1, w2, b2):
    h = jnp.maximum(x @ w1 + b1, 0.0)
    logits = h @ w2 + b2
    return jax.nn.softmax(logits, axis=-1)


if __name__ == "__main__":
    key = jax.random.PRNGKey(0)
    k_x, k_p, k_x3, k_p3 = jax.random.split(key, 4)

    # CartPole: state_dim=4, action_dim=2.  Small shapes for the smoke test.
    state_dim, action_dim, batch = 4, 2, 64
    x = jax.random.normal(k_x, (batch, state_dim), jnp.float32)
    w1, b1, w2, b2 = init_params(k_p, state_dim, action_dim)
    ref = reference_forward(x, w1, b1, w2, b2)

    # (a) Batched case exercising a 2-step grid (blocks of 32 rows).
    probs = jax.block_until_ready(policy_net_forward(x, w1, b1, w2, b2, block_b=32))
    assert probs.shape == (batch, action_dim)
    assert jnp.allclose(probs, ref, atol=1e-5, rtol=1e-5)
    assert jnp.allclose(jnp.sum(probs, axis=-1), 1.0, atol=1e-5)

    # (b) Tiny, ragged batch (padding path, single grid step).
    probs_small = jax.block_until_ready(policy_net_forward(x[:5], w1, b1, w2, b2))
    assert probs_small.shape == (5, action_dim)
    assert jnp.allclose(probs_small, ref[:5], atol=1e-5, rtol=1e-5)

    # (c) Generic softmax branch (action_dim != 2).
    x3 = jax.random.normal(k_x3, (16, state_dim), jnp.float32)
    g1, g2, g3, g4 = init_params(k_p3, state_dim, 3)
    probs3 = jax.block_until_ready(policy_net_forward(x3, g1, g2, g3, g4))
    ref3 = reference_forward(x3, g1, g2, g3, g4)
    assert probs3.shape == (16, 3)
    assert jnp.allclose(probs3, ref3, atol=1e-5, rtol=1e-5)
    assert jnp.allclose(jnp.sum(probs3, axis=-1), 1.0, atol=1e-5)

    print("KERNEL_OK")
</pallas_src>

<mosaic_0001>
module attributes {stable_mosaic.version = 11 : i64} {
  func.func @kernel(%arg0: i32, %arg1: memref<136x128xf32, #tpu.memory_space<vmem>>, %arg2: memref<32x4xf32, #tpu.memory_space<vmem>>, %arg3: memref<32x128xf32, #tpu.memory_space<vmem>>) attributes {dimension_semantics = [#tpu.dimension_semantics<parallel>], iteration_bounds = array<i64: 2>, scalar_prefetch = 0 : i64, scratch_operands = 0 : i64, tpu.core_type = #tpu.core_type<tc>, window_params = [{pipeline_mode = #tpu.pipeline_mode<synchronous>, transform_indices = @transform_0, window_bounds = array<i64: 136, 128>}, {transform_indices = @transform_1, window_bounds = array<i64: 32, 4>}, {transform_indices = @transform_2, window_bounds = array<i64: 32, 128>}]} {
    %c0 = arith.constant 0 : index
    %c0_0 = arith.constant 0 : index
    %0 = vector.load %arg2[%c0, %c0_0] : memref<32x4xf32, #tpu.memory_space<vmem>>, vector<32x4xf32>
    %c4 = arith.constant 4 : index
    %c0_1 = arith.constant 0 : index
    %1 = vector.load %arg1[%c4, %c0_1] : memref<136x128xf32, #tpu.memory_space<vmem>>, vector<1x128xf32>
    %2 = vector.shape_cast %1 : vector<1x128xf32> to vector<1x128xf32>
    %3 = vector.broadcast %2 : vector<1x128xf32> to vector<32x128xf32>
    %4 = vector.extract_strided_slice %0 {offsets = [0, 0], sizes = [32, 1], strides = [1, 1]} : vector<32x4xf32> to vector<32x1xf32>
    %c0_2 = arith.constant 0 : index
    %c0_3 = arith.constant 0 : index
    %5 = vector.load %arg1[%c0_2, %c0_3] : memref<136x128xf32, #tpu.memory_space<vmem>>, vector<1x128xf32>
    %6 = vector.broadcast %4 : vector<32x1xf32> to vector<32x128xf32>
    %7 = vector.broadcast %5 : vector<1x128xf32> to vector<32x128xf32>
    %8 = arith.mulf %6, %7 : vector<32x128xf32>
    %9 = arith.addf %3, %8 : vector<32x128xf32>
    %10 = vector.extract_strided_slice %0 {offsets = [0, 1], sizes = [32, 1], strides = [1, 1]} : vector<32x4xf32> to vector<32x1xf32>
    %c1 = arith.constant 1 : index
    %c0_4 = arith.constant 0 : index
    %11 = vector.load %arg1[%c1, %c0_4] : memref<136x128xf32, #tpu.memory_space<vmem>>, vector<1x128xf32>
    %12 = vector.broadcast %10 : vector<32x1xf32> to vector<32x128xf32>
    %13 = vector.broadcast %11 : vector<1x128xf32> to vector<32x128xf32>
    %14 = arith.mulf %12, %13 : vector<32x128xf32>
    %15 = arith.addf %9, %14 : vector<32x128xf32>
    %16 = vector.extract_strided_slice %0 {offsets = [0, 2], sizes = [32, 1], strides = [1, 1]} : vector<32x4xf32> to vector<32x1xf32>
    %c2 = arith.constant 2 : index
    %c0_5 = arith.constant 0 : index
    %17 = vector.load %arg1[%c2, %c0_5] : memref<136x128xf32, #tpu.memory_space<vmem>>, vector<1x128xf32>
    %18 = vector.broadcast %16 : vector<32x1xf32> to vector<32x128xf32>
    %19 = vector.broadcast %17 : vector<1x128xf32> to vector<32x128xf32>
    %20 = arith.mulf %18, %19 : vector<32x128xf32>
    %21 = arith.addf %15, %20 : vector<32x128xf32>
    %22 = vector.extract_strided_slice %0 {offsets = [0, 3], sizes = [32, 1], strides = [1, 1]} : vector<32x4xf32> to vector<32x1xf32>
    %c3 = arith.constant 3 : index
    %c0_6 = arith.constant 0 : index
    %23 = vector.load %arg1[%c3, %c0_6] : memref<136x128xf32, #tpu.memory_space<vmem>>, vector<1x128xf32>
    %24 = vector.broadcast %22 : vector<32x1xf32> to vector<32x128xf32>
    %25 = vector.broadcast %23 : vector<1x128xf32> to vector<32x128xf32>
    %26 = arith.mulf %24, %25 : vector<32x128xf32>
    %27 = arith.addf %21, %26 : vector<32x128xf32>
    %cst = arith.constant 0.000000e+00 : f32
    %28 = vector.broadcast %cst : f32 to vector<32x128xf32>
    %29 = arith.maximumf %27, %28 : vector<32x128xf32>
    %c8 = arith.constant 8 : index
    %c0_7 = arith.constant 0 : index
    %30 = vector.load %arg1[%c8, %c0_7] : memref<136x128xf32, #tpu.memory_space<vmem>>, vector<128x128xf32>
    %cst_8 = arith.constant dense<0.000000e+00> : vector<32x128xf32>
    %31 = tpu.matmul %29, %30, %cst_8 {dimension_numbers = #tpu.dot_dimension_numbers<[1], [0], [0], [1], [0, 0, 1, 1], [], []>} : vector<32x128xf32>, vector<128x128xf32>, vector<32x128xf32> -> vector<32x128xf32>
    %c5 = arith.constant 5 : index
    %c0_9 = arith.constant 0 : index
    %32 = vector.load %arg1[%c5, %c0_9] : memref<136x128xf32, #tpu.memory_space<vmem>>, vector<1x128xf32>
    %33 = vector.broadcast %32 : vector<1x128xf32> to vector<32x128xf32>
    %34 = arith.addf %31, %33 : vector<32x128xf32>
    %35 = vector.extract_strided_slice %34 {offsets = [0, 1], sizes = [32, 1], strides = [1, 1]} : vector<32x128xf32> to vector<32x1xf32>
    %36 = vector.extract_strided_slice %34 {offsets = [0, 0], sizes = [32, 1], strides = [1, 1]} : vector<32x128xf32> to vector<32x1xf32>
    %37 = arith.subf %35, %36 : vector<32x1xf32>
    %38 = math.exp %37 : vector<32x1xf32>
    %cst_10 = arith.constant 1.000000e+00 : f32
    %39 = vector.broadcast %cst_10 : f32 to vector<32x1xf32>
    %40 = arith.addf %39, %38 : vector<32x1xf32>
    %cst_11 = arith.constant 1.000000e+00 : f32
    %41 = vector.broadcast %cst_11 : f32 to vector<32x1xf32>
    %42 = arith.divf %41, %40 : vector<32x1xf32>
    %cst_12 = arith.constant 1.000000e+00 : f32
    %43 = vector.broadcast %cst_12 : f32 to vector<32x1xf32>
    %44 = arith.subf %43, %42 : vector<32x1xf32>
    %45 = tpu.iota {dimensions = array<i32: 1>} : vector<32x128xi32>
    %c0_i32 = arith.constant 0 : i32
    %46 = vector.broadcast %c0_i32 : i32 to vector<32x128xi32>
    %47 = arith.cmpi eq, %45, %46 : vector<32x128xi32>
    %c1_i32 = arith.constant 1 : i32
    %48 = vector.broadcast %c1_i32 : i32 to vector<32x128xi32>
    %49 = arith.cmpi eq, %45, %48 : vector<32x128xi32>
    %cst_13 = arith.constant 0.000000e+00 : f32
    %50 = vector.shape_cast %44 : vector<32x1xf32> to vector<32x1xf32>
    %51 = vector.broadcast %50 : vector<32x1xf32> to vector<32x128xf32>
    %52 = vector.broadcast %cst_13 : f32 to vector<32x128xf32>
    %53 = arith.select %49, %51, %52 : vector<32x128xi1>, vector<32x128xf32>
    %54 = vector.shape_cast %42 : vector<32x1xf32> to vector<32x1xf32>
    %55 = vector.broadcast %54 : vector<32x1xf32> to vector<32x128xf32>
    %56 = arith.select %47, %55, %53 : vector<32x128xi1>, vector<32x128xf32>
    %c0_14 = arith.constant 0 : index
    %c0_15 = arith.constant 0 : index
    %57 = vector.load %arg3[%c0_14, %c0_15] : memref<32x128xf32, #tpu.memory_space<vmem>>, vector<32x128xf32>
    tpu.vector_store %arg3[%c0_14, %c0_15], %56 {strides = array<i32>} : memref<32x128xf32, #tpu.memory_space<vmem>>, vector<32x128xf32>,
    return
  }
  func.func @transform_0(%arg0: i32) -> (i32, i32) {
    %c0_i32 = arith.constant 0 : i32
    %c0_i32_0 = arith.constant 0 : i32
    %c0_i32_1 = arith.constant 0 : i32
    return %c0_i32, %c0_i32_0 : i32, i32
  }
  func.func @transform_1(%arg0: i32) -> (i32, i32) {
    %c0_i32 = arith.constant 0 : i32
    %c0_i32_0 = arith.constant 0 : i32
    return %arg0, %c0_i32 : i32, i32
  }
  func.func @transform_2(%arg0: i32) -> (i32, i32) {
    %c0_i32 = arith.constant 0 : i32
    %c0_i32_0 = arith.constant 0 : i32
    return %arg0, %c0_i32 : i32, i32
  }
}

</mosaic_0001>

<bundles_post_ra>
// kernel: tpu_custom_call.1
= control target key start
LH: loop header
LB: loop body
LE: loop exit
PB: predicated region body
PF: predicated region fallthrough
CT: control target
= control target key end

     0   :  { %7 = vsyncpa [#allocation3], 0  ;;  %s956_s0 = inlined_call_operand.hbm [shape: f32[136,128], index: 0, kind: input, shape index: {}]   ;;  %s957_s1 = inlined_call_operand.vmem [shape: f32[64,4], index: 1, kind: input, shape index: {}]   ;;  %s958_s2 = inlined_call_operand.hbm [shape: f32[64,128], index: 2, kind: output, shape index: {}]  }
   0x1   :  { %8 = vsyncpa [#allocation4], 0 }
   0x2   :  { %10 = vsyncpa [#allocation4 + $0x1], 0  ;;  %s850_s9 = smov 0   ;;  %s852_s10 = smov 0  }
   0x3   :  { %s854_s11 = smov 0   ;;  %s856_s12 = smov 0  }
   0x4 LB: > { %s871_s13 = sadd.s32 4294967295, %s823_s12   ;;  %s569_s14 = sadd.s32 4294967294, %s823_s12   ;;  %s823_s12 = sphi %s856_s12, %s964_s12   ;;  %s819_s11 = sphi %s854_s11, %s963_s11   ;;  %s815_s10 = sphi %s852_s10, %s962_s10   ;;  %s811_s9 = sphi %s850_s9, %s961_s9  }
   0x5   : > { %s875_s15 = sadd.s32 1, %s823_s12   ;;  %s70_s16 = sadd.s32 1, %s819_s11 }
   0x6   : > { %s67_s17 = ssub.s32 %s823_s12, %s875_s15  ;;  %p80_p0 = scmp.ne.s32.totalorder %s819_s11, %s815_s10 }
   0x7   : > { %p68_p1 = scmp.eq.s32.totalorder %s67_s17, 0  ;;  %p81_p2 = scmp.eq.s32.totalorder %s871_s13, 1 }
   0x8   : > { %p86_p3 = scmp.ne.s32.totalorder %s815_s10, %s811_s9  ;;  %p87_p4 = scmp.eq.s32.totalorder %s569_s14, 1 }
   0x9   : > { %s886_s18 = scalar_select %p68_p1, %s819_s11, %s70_s16  }
   0xa   : > { %p888_p5 = por %p81_p2, %p80_p0  ;;  %p892_p6 = por %p87_p4, %p86_p3 }
   0xb   : > { %p570_p7 = scmp.ge.s32.totalorder %s823_s12, 1  ;;  %p94_p8 = scmp.lt.s32.totalorder %s823_s12, 3 }
   0xc   : > { %p646_p9 = scmp.eq.s32.totalorder %s871_s13, 0  ;;  %s105_s23 = sshll.u32 %s956_s0, 4  ;;  %s106_s23 = int_to_ptr.hbm [resolvable:$true] %s105_s23 }
   0xd   : > { %p95_p10 = pnand %p570_p7, %p94_p8  ;;  %s825_s24 = smov [#allocation2]  }
   0xe   : > { %s107_s25 = sshll.u32 %s825_s24, 4  ;;  %s826_s26 = smov 128   ;;  %s108_s25 = int_to_ptr.vmem [resolvable:$true] %s107_s25 }
   0xf   : > { %p638_p11 = pneg %p95_p10  ;;  %s827_s27 = smov 8  }
  0x10   : > { %132 = sbr.rel (%p95_p10) target bundleno = 605 (0x25d), region = 28 }
  0x11   : > { %p639_p12 = pnand %p646_p9, %p638_p11 }
  0x13   : > { %641 = dma.hbm_to_vmem [thread:$0]  (!%p639_p12), %s106_s23, 2176, %s108_s25, [#allocation3], %s826_s26, %s826_s26, %s827_s27  }
  0x15   : > { %802 = dma.done.wait (%p646_p9), [#allocation3], 2176  }
  0x16   : > { %804 = vsyncadd (%p646_p9), [#allocation3], 4294965120  ;;  %s576_s28 = sshll.u32 %s871_s13, 2  ;;  %v828_v0 = vmov 1   ;;  %v829_v1 = vmov 0   ;;  %v830_v2 = vmov 2  }
  0x17   : > { %692 = vset.pattern.permute.xlu1 %v828_v0  ;;  %691 = vset.pattern.permute.xlu0 %v829_v1  ;;  %p156_p13 = scmp.lt.s32.totalorder %s576_s28, 7  ;;  %v295_v5 = vld [vmem:[#allocation2 + $0x80] sm:$0xff]  ;;  %v294_v6 = vld [vmem:[#allocation2 + $0x78] sm:$0xff]  ;;  %v293_v9 = vld [vmem:[#allocation2 + $0x70] sm:$0xff]  ;;  %v831_v10 = vmov 3   ;;  %s832_s5 = smov 1  }
  0x18   : > { %693 = vset.pattern.permute.xlu2 %v830_v2  ;;  %585 = vmatpush.msra.mxu2 %v295_v5  ;;  %v292_v11 = vld [vmem:[#allocation2 + $0x68] sm:$0xff]  ;;  %v291_v12 = vld [vmem:[#allocation2 + $0x60] sm:$0xff]  ;;  %v290_v13 = vld [vmem:[#allocation2 + $0x58] sm:$0xff]  ;;  %s152_s6 = sand.u32 1, %s815_s10   ;;  %s583_s14 = sshll.u32 %s871_s13, 5 }
  0x19   : > { %s966_s28 = smov (!%p156_p13, %s576_s28), 7  ;;  %586 = vmatpush.msra.mxu3 %v295_v5  ;;  %298 = vmatpush.msra.mxu0 %v295_v5  ;;  %v289_v14 = vld [vmem:[#allocation2 + $0x50] sm:$0xff]  ;;  %v288_v15 = vld [vmem:[#allocation2 + $0x48] sm:$0xff]  ;;  %v287_v16 = vld [vmem:[#allocation2 + $0x40] sm:$0xff]  ;;  %s575_s7 = sshll.u32 %s152_s6, 5 }
  0x1a   : > { %s577_s29 = sshll.u32 %s966_s28, 3  ;;  %584 = vmatpush.msra.mxu1 %v295_v5  ;;  %588 = vmatpush.msra.mxu2 %v294_v6  ;;  %v286_v17 = vld [vmem:[#allocation2 + $0x38] sm:$0xff]  ;;  %v285_v18 = vld [vmem:[#allocation2 + $0x30] sm:$0xff]  ;;  %v284_v19 = vld [vmem:[#allocation2 + $0x28] sm:$0xff]  ;;  %s154_s8 = scalar_lea.vmem [#allocation5], %s575_s7 }
  0x1b   : > { %s159_s4 = scalar_lea.vmem %s957_s1, %s577_s29  ;;  %589 = vmatpush.msra.mxu3 %v294_v6  ;;  %299 = vmatpush.msra.mxu0 %v294_v6  ;;  %v283_v20 = vld [vmem:[#allocation2 + $0x20] sm:$0xff]  ;;  %v282_v21 = vld [vmem:[#allocation2 + $0x18] sm:$0xff]  ;;  %v281_v22 = vld [vmem:[#allocation2 + $0x10] sm:$0xff]  ;;  %s491_s21 = scalar_lea.hbm %s958_s2, %s583_s14 }
  0x1c   : > { %v164_v3 = vld [vmem:[%s159_s4 + $0x10] sm:$0xff]  ;;  %v165_v4 = vld [vmem:[%s159_s4 + $0x18] sm:$0xff]  ;;  %v162_v7 = vld [vmem:[%s159_s4] sm:$0xff]  ;;  %591 = vmatpush.msra.mxu2 %v293_v9  ;;  %587 = vmatpush.msra.mxu1 %v294_v6  ;;  %s492_s22 = sshll.u32 %s154_s8, 4  ;;  %s494_s23 = sshll.u32 %s491_s21, 4  ;;  %s493_s22 = int_to_ptr.vmem [resolvable:$true] %s492_s22  ;;  %s495_s23 = int_to_ptr.hbm [resolvable:$true] %s494_s23 }
  0x1d   : > { %208 = vperm.xlu1 %692, %v164_v3   ;;  %181 = vperm.xlu0 %691, %v164_v3   ;;  %v163_v8 = vld [vmem:[%s159_s4 + $0x8] sm:$0xff]  ;;  %v708_v26 = vld [vmem:[#allocation2] ss:$0 sm:$0xff]  ;;  %v705_v27 = vld [vmem:[#allocation2 + $0x2] ss:$0 sm:$0xff]  ;;  %s480_s13 = scalar_lea.sflag [#allocation4], %s152_s6 }
  0x1e   : > { %234 = vperm.xlu2 %693, %v164_v3   ;;  %592 = vmatpush.msra.mxu3 %v293_v9  ;;  %v280_v23 = vld [vmem:[#allocation2 + $0x8] sm:$0xff]  ;;  %v706_v28 = vld [vmem:[#allocation2 + $0x1] ss:$0 sm:$0xff]  ;;  %v707_v29 = vld [vmem:[#allocation2 + $0x4] ss:$0 sm:$0xff]  ;;  %s771_s24 = sshra.s32 %s495_s23, 4  ;;  %s772_s24 = int_to_ptr.hbm [resolvable:$true] %s771_s24 }
  0x1f   : > { %594 = vmatpush.msra.mxu2 %v292_v11  ;;  %300 = vmatpush.msra.mxu0 %v293_v9  ;;  %v709_v33 = vld [vmem:[#allocation2 + $0x3] ss:$0 sm:$0xff]  ;;  %s773_s25 = scalar_lea.hbm %s772_s24, 32  ;;  %s777_s28 = scalar_lea.hbm %s958_s2, 64 }
  0x20   : > { %595 = vmatpush.msra.mxu3 %v292_v11  ;;  %590 = vmatpush.msra.mxu1 %v293_v9  ;;  %p774_p0 = scmp.ne.s32.totalorder %s772_s24, %s773_s25  ;;  %p778_p3 = scmp.lt.s32.totalorder %s772_s24, %s958_s2 }
  0x21   : > { %301 = vmatpush.msra.mxu0 %v292_v11  ;;  %597 = vmatpush.msra.mxu2 %v291_v12  ;;  %p779_p4 = scmp.lt.s32.totalorder %s777_s28, %s773_s25 }
  0x22   : > { %593 = vmatpush.msra.mxu1 %v292_v11  ;;  %598 = vmatpush.msra.mxu3 %v291_v12  ;;  %p775_p1 = pnand %p774_p0, %p888_p5 }
  0x23   : > { %302 = vmatpush.msra.mxu0 %v291_v12  ;;  %600 = vmatpush.msra.mxu2 %v290_v13  ;;  %p780_p7 = por %p779_p4, %p778_p3 }
  0x24   : > { %596 = vmatpush.msra.mxu1 %v291_v12  ;;  %601 = vmatpush.msra.mxu3 %v290_v13  ;;  %p776_p2 = pneg %p775_p1 }
  0x25   : > { %212 = vperm.xlu1 %692, %v165_v4   ;;  %186 = vperm.xlu0 %691, %v165_v4  }
  0x26   : > { %238 = vperm.xlu2 %693, %v165_v4   ;;  %303 = vmatpush.msra.mxu0 %v290_v13  ;;  %p781_p8 = pnand %p780_p7, %p776_p2 }
  0x27   : > { %599 = vmatpush.msra.mxu1 %v290_v13  ;;  %603 = vmatpush.msra.mxu2 %v289_v14 }
  0x28   : > { %604 = vmatpush.msra.mxu3 %v289_v14  ;;  %304 = vmatpush.msra.mxu0 %v289_v14 }
  0x29   : > { %602 = vmatpush.msra.mxu1 %v289_v14  ;;  %606 = vmatpush.msra.mxu2 %v288_v15 }
  0x2a   : > { %607 = vmatpush.msra.mxu3 %v288_v15  ;;  %305 = vmatpush.msra.mxu0 %v288_v15 }
  0x2b   : > { %605 = vmatpush.msra.mxu1 %v288_v15  ;;  %609 = vmatpush.msra.mxu2 %v287_v16 }
  0x2c   : > { %610 = vmatpush.msra.mxu3 %v287_v16  ;;  %306 = vmatpush.msra.mxu0 %v287_v16 }
  0x2d   : > { %694 = vset.pattern.permute.xlu1 %v829_v1  ;;  %171 = vperm.xlu0 %691, %v162_v7  }
  0x2e   : > { %176 = vperm.xlu1 %694, %v163_v8   ;;  %695 = vset.pattern.permute.xlu2 %v831_v10 }
  0x2f   : > { %260 = vperm.xlu2 %695, %v164_v3   ;;  %608 = vmatpush.msra.mxu1 %v287_v16 }
  0x30   : > { %612 = vmatpush.msra.mxu2 %v286_v17  ;;  %613 = vmatpush.msra.mxu3 %v286_v17 }
  0x31   : > { %307 = vmatpush.msra.mxu0 %v286_v17  ;;  %611 = vmatpush.msra.mxu1 %v286_v17  ;;  %v710_v17 = vld [vmem:[#allocation2 + $0x5] ss:$0 sm:$0xff] }
  0x32   : > { %615 = vmatpush.msra.mxu2 %v285_v18  ;;  %616 = vmatpush.msra.mxu3 %v285_v18 }
  0x33   : > { %308 = vmatpush.msra.mxu0 %v285_v18  ;;  %614 = vmatpush.msra.mxu1 %v285_v18 }
  0x34   : > { %618 = vmatpush.msra.mxu2 %v284_v19  ;;  %619 = vmatpush.msra.mxu3 %v284_v19 }
  0x35   : > { %696 = vset.pattern.permute.xlu0 %v831_v10  ;;  %309 = vmatpush.msra.mxu0 %v284_v19 }
  0x36   : > { %697 = vset.pattern.permute.xlu1 %v828_v0  ;;  %264 = vperm.xlu0 %696, %v165_v4  }
  0x37   : > { %200 = vperm.xlu1 %697, %v162_v7   ;;  %698 = vset.pattern.permute.xlu2 %v828_v0 }
  0x38   : > { %204 = vperm.xlu2 %698, %v163_v8   ;;  %617 = vmatpush.msra.mxu1 %v284_v19 }
  0x39   : > { %621 = vmatpush.msra.mxu2 %v283_v20  ;;  %622 = vmatpush.msra.mxu3 %v283_v20 }
  0x3a   : > { %310 = vmatpush.msra.mxu0 %v283_v20  ;;  %620 = vmatpush.msra.mxu1 %v283_v20 }
  0x3b   : > { %624 = vmatpush.msra.mxu2 %v282_v21  ;;  %625 = vmatpush.msra.mxu3 %v282_v21 }
  0x3c   : > { %311 = vmatpush.msra.mxu0 %v282_v21  ;;  %623 = vmatpush.msra.mxu1 %v282_v21 }
  0x3d   : > { %627 = vmatpush.msra.mxu2 %v281_v22  ;;  %628 = vmatpush.msra.mxu3 %v281_v22 }
  0x3e   : > { %252 = vperm.xlu0 %696, %v162_v7   ;;  %312 = vmatpush.msra.mxu0 %v281_v22 }
  0x3f   : > { %699 = vset.pattern.permute.xlu1 %v830_v2  ;;  %626 = vmatpush.msra.mxu1 %v281_v22 }
  0x40   : > { %226 = vperm.xlu1 %699, %v162_v7   ;;  %700 = vset.pattern.permute.xlu2 %v830_v2 }
  0x41   : > { %230 = vperm.xlu2 %700, %v163_v8   ;;  %630 = vmatpush.msra.mxu2 %v280_v23 }
  0x42   : > { %631 = vmatpush.msra.mxu3 %v280_v23  ;;  %313 = vmatpush.msra.mxu0 %v280_v23 }
  0x43   : > { %629 = vmatpush.msra.mxu1 %v280_v23 }
  0x46   : > { %703 = vset.pattern.permute.xlu0 %v828_v0 }
  0x48   : > { %701 = vset.pattern.permute.xlu1 %v831_v10 }
  0x49   : > { %256 = vperm.xlu1 %701, %v163_v8   ;;  %702 = vset.pattern.permute.xlu2 %v828_v0 }
  0x51   : > { %704 = vset.pattern.permute.xlu1 %v828_v0 }
  0x78   : > { %v235_v24 = vpop.permute.xlu2 %234 }
  0x79   : > { %v244_v35 = vmul.f32 %v705_v27, %v235_v24 }
  0x80   : > { %v239_v25 = vpop.permute.xlu2 %238 }
  0x81   : > { %v245_v51 = vmul.f32 %v705_v27, %v239_v25 }
  0x89   : > { %v261_v34 = vpop.permute.xlu2 %260 }
  0x8a   : > { %v270_v39 = vmul.f32 %v709_v33, %v261_v34 }
  0x8f   : > { %v209_v30 = vpop.permute.xlu1 %208  ;;  %v182_v31 = vpop.permute.xlu0 %181 }
  0x90   : > { %v192_v32 = vmul.f32 %v708_v26, %v182_v31  ;;  %v218_v36 = vmul.f32 %v706_v28, %v209_v30 }
  0x92   : > { %v196_v37 = vadd.f32 %v707_v29, %v192_v32  ;;  %v205_v56 = vpop.permute.xlu2 %204 }
  0x93   : > { %v217_v4 = vmul.f32 %v706_v28, %v205_v56 }
  0x94   : > { %v222_v38 = vadd.f32 %v218_v36, %v196_v37 }
  0x96   : > { %v248_v40 = vadd.f32 %v244_v35, %v222_v38 }
  0x97   : > { %v213_v41 = vpop.permute.xlu1 %212  ;;  %v187_v42 = vpop.permute.xlu0 %186 }
  0x98   : > { %v274_v43 = vadd.f32 %v270_v39, %v248_v40  ;;  %v193_v45 = vmul.f32 %v708_v26, %v187_v42  ;;  %v219_v49 = vmul.f32 %v706_v28, %v213_v41 }
  0x9a   : > { %v278_v44 = vmax.f32 %v274_v43, 0.0  ;;  %v197_v48 = vadd.f32 %v707_v29, %v193_v45 }
  0x9b   : > { %v231_v6 = vpop.permute.xlu2 %230 }
  0x9c   : > { %320 = vmatmul.f32.vlgmr.msra.gmra.mxu2 %v278_v44  ;;  %v223_v50 = vadd.f32 %v219_v49, %v197_v48  ;;  %v243_v10 = vmul.f32 %v705_v27, %v231_v6 }
  0x9e   : > { %v249_v55 = vadd.f32 %v245_v51, %v223_v50 }
  0x9f   : > { %v172_v46 = vpop.permute.xlu0 %171 }
  0xa0   : > { %v177_v47 = vpop.permute.xlu1 %176  ;;  %v190_v57 = vmul.f32 %v708_v26, %v172_v46 }
  0xa1   : > { %v191_v62 = vmul.f32 %v708_v26, %v177_v47 }
  0xa2   : > { %v194_v60 = vadd.f32 %v707_v29, %v190_v57 }
  0xa3   : > { %v195_v5 = vadd.f32 %v707_v29, %v191_v62 }
  0xa5   : > { %v221_v9 = vadd.f32 %v217_v4, %v195_v5 }
  0xa7   : > { %v247_v13 = vadd.f32 %v243_v10, %v221_v9 }
  0xa8   : > { %v265_v52 = vpop.permute.xlu0 %264 }
  0xa9   : > { %v271_v53 = vmul.f32 %v709_v33, %v265_v52  ;;  %v201_v54 = vpop.permute.xlu1 %200 }
  0xaa   : > { %v216_v61 = vmul.f32 %v706_v28, %v201_v54 }
  0xab   : > { %v275_v58 = vadd.f32 %v271_v53, %v249_v55 }
  0xac   : > { %v220_v1 = vadd.f32 %v216_v61, %v194_v60 }
  0xad   : > { %v279_v59 = vmax.f32 %v275_v58, 0.0 }
  0xaf   : > { %323 = vmatmul.f32.vlgmr.msra.gmra.mxu3 %v279_v59 }
  0xb0   : > { %v253_v63 = vpop.permute.xlu0 %252 }
  0xb1   : > { %v268_v3 = vmul.f32 %v709_v33, %v253_v63 }
  0xb2   : > { %v227_v0 = vpop.permute.xlu1 %226 }
  0xb3   : > { %v242_v2 = vmul.f32 %v705_v27, %v227_v0 }
  0xb5   : > { %v246_v7 = vadd.f32 %v242_v2, %v220_v1 }
  0xb7   : > { %v272_v8 = vadd.f32 %v268_v3, %v246_v7 }
  0xb9   : > { %v276_v11 = vmax.f32 %v272_v8, 0.0 }
  0xbb   : > { %v257_v12 = vpop.permute.xlu1 %256  ;;  %314 = vmatmul.f32.vlgmr.msra.gmra.mxu0 %v276_v11 }
  0xbc   : > { %v269_v14 = vmul.f32 %v709_v33, %v257_v12 }
  0xbe   : > { %v273_v15 = vadd.f32 %v269_v14, %v247_v13 }
  0xc0   : > { %v277_v16 = vmax.f32 %v273_v15, 0.0 }
  0xc2   : > { %317 = vmatmul.f32.vlgmr.msra.gmra.mxu1 %v277_v16 }
 0x11f   : > { %v321_v18 = vpop.f32.mrf.mxu2 }
 0x120   : > { %v322_v19 = vadd.f32 %v710_v17, %v321_v18 }
 0x122   : > { %335 = vrot.lane.b32.xlu1 %v322_v19, %s832_s5 }
 0x132   : > { %v324_v22 = vpop.f32.mrf.mxu3 }
 0x133   : > { %v325_v25 = vadd.f32 %v710_v17, %v324_v22 }
 0x138   : > { %v315_v20 = vpop.f32.mrf.mxu0 }
 0x139   : > { %v316_v21 = vadd.f32 %v710_v17, %v315_v20 }
 0x13b   : > { %331 = vrot.lane.b32.xlu2 %v316_v21, %s832_s5 }
 0x13f   : > { %v318_v23 = vpop.f32.mrf.mxu1 }
 0x140   : > { %v319_v24 = vadd.f32 %v710_v17, %v318_v23 }
 0x142   : > { %333 = vrot.lane.b32.xlu0 %v319_v24, %s832_s5 }
 0x143   : > { %337 = vrot.lane.b32.xlu2 %v325_v25, %s832_s5 }
 0x194   : > { %v336_v26 = vpop.permute.xlu1 %335 }
 0x195   : > { %v345_v27 = vsub.f32 %v322_v19, %v336_v26  ;;  %v332_v28 = vpop.permute.xlu2 %331  ;;  %v423_v26 = vlaneseq }
 0x196   : > { %v343_v29 = vsub.f32 %v316_v21, %v332_v28 }
 0x197   : > { %v351_v30 = vmul.f32 1.442695, %v345_v27  ;;  %v424_v27 = vand.u32 127, %v423_v26 }
 0x198   : > { %v347_v31 = vmul.f32 1.442695, %v343_v29 }
 0x199   : > { %711 = vpow2.f32 %v351_v30 }
 0x19a   : > { %713 = vpow2.f32 %v347_v31 }
 0x19d   : > { %v338_v32 = vpop.permute.xlu2 %337 }
 0x19e   : > { %v346_v33 = vsub.f32 %v325_v25, %v338_v32 }
 0x19f   : > { %v712_v34 = vpop.eup %711 }
 0x1a0   : > { %v714_v35 = vpop.eup %713  ;;  %v357_v36 = vadd.f32 1.0, %v712_v34  ;;  %v353_v37 = vmul.f32 1.442695, %v346_v33 }
 0x1a1   : > { %v355_v38 = vadd.f32 1.0, %v714_v35 }
 0x1a2   : > { %715 = vrcp.f32 %v357_v36  ;;  %v400_v54 = vand.u32 2147483648, %v357_v36  ;;  %vm394_vm5 = vweird.f32 %v357_v36  ;;  %v398_v56 = vand.u32 2147483647, %v357_v36 }
 0x1a3   : > { %717 = vrcp.f32 %v355_v38  ;;  %v370_v47 = vand.u32 2147483648, %v355_v38  ;;  %v368_v50 = vand.u32 2147483647, %v355_v38  ;;  %vm364_vm1 = vweird.f32 %v355_v38 }
 0x1a4   : > { %719 = vpow2.f32 %v353_v37  ;;  %v401_v0 = vor.u32 1.1754944e-38, %v400_v54  ;;  %vm399_vm7 = vcmp.eq.f32.partialorder %v398_v56, 8.507059e+37 }
 0x1a5   : > { %v371_v53 = vor.u32 1.1754944e-38, %v370_v47  ;;  %vm369_vm4 = vcmp.eq.f32.partialorder %v368_v50, 8.507059e+37 }
 0x1a8   : > { %v716_v39 = vpop.eup %715 }
 0x1a9   : > { %v718_v40 = vpop.eup %717  ;;  %v390_v41 = vmul.f32 %v716_v39, %v357_v36  ;;  %vm395_vm2 = vweird.f32 %v716_v39 }
 0x1aa   : > { %v720_v42 = vpop.eup %719  ;;  %v360_v43 = vmul.f32 %v718_v40, %v355_v38  ;;  %vm365_vm0 = vweird.f32 %v718_v40  ;;  %vm396_vm6 = vmor %vm394_vm5, %vm395_vm2 }
 0x1ab   : > { %v358_v44 = vadd.f32 1.0, %v720_v42  ;;  %v391_v45 = vsub.f32 1.0, %v390_v41  ;;  %vm366_vm3 = vmor %vm364_vm1, %vm365_vm0  ;;  %vm425_vm0 = vcmp.eq.s32.totalorder %v424_v27, 0  ;;  %vm426_vm1 = vcmp.eq.s32.totalorder %v424_v27, 1 }
 0x1ac   : > { %v361_v46 = vsub.f32 1.0, %v360_v43 }
 0x1ad   : > { %721 = vrcp.f32 %v358_v44  ;;  %v392_v48 = vmul.f32 %v716_v39, %v391_v45  ;;  %v415_v7 = vand.u32 2147483648, %v358_v44  ;;  %vm409_vm9 = vweird.f32 %v358_v44 }
 0x1ae   : > { %v362_v49 = vmul.f32 %v718_v40, %v361_v46  ;;  %v413_v8 = vand.u32 2147483647, %v358_v44 }
 0x1af   : > { %v393_v52 = vadd.f32 %v716_v39, %v392_v48  ;;  %v416_v12 = vor.u32 1.1754944e-38, %v415_v7 }
 0x1b0   : > { %v363_v51 = vadd.f32 %v718_v40, %v362_v49  ;;  %vm414_vm11 = vcmp.eq.f32.partialorder %v413_v8, 8.507059e+37 }
 0x1b1   : > { %v397_v61 = vsel %vm396_vm6, %v716_v39, %v393_v52 }
 0x1b2   : > { %v367_v55 = vsel %vm366_vm3, %v718_v40, %v363_v51  ;;  %v402_v3 = vsel %vm399_vm7, %v401_v0, %v397_v61 }
 0x1b3   : > { %v722_v57 = vpop.eup %721  ;;  %v372_v58 = vsel %vm369_vm4, %v371_v53, %v367_v55  ;;  %v421_v5 = vsub.f32 1.0, %v402_v3 }
 0x1b4   : > { %453 = vperm.xlu2 %702, %v372_v58   ;;  %v419_v59 = vsub.f32 1.0, %v372_v58  ;;  %v334_v60 = vpop.permute.xlu0 %333  ;;  %v405_v62 = vmul.f32 %v722_v57, %v358_v44  ;;  %vm410_vm8 = vweird.f32 %v722_v57 }
 0x1b5   : > { %v344_v63 = vsub.f32 %v319_v24, %v334_v60  ;;  %vm411_vm10 = vmor %vm409_vm9, %vm410_vm8 }
 0x1b6   : > { %429 = vperm.xlu0 %703, %v419_v59   ;;  %v406_v1 = vsub.f32 1.0, %v405_v62 }
 0x1b7   : > { %v349_v2 = vmul.f32 1.442695, %v344_v63 }
 0x1b8   : > { %v407_v4 = vmul.f32 %v722_v57, %v406_v1 }
 0x1b9   : > { %723 = vpow2.f32 %v349_v2 }
 0x1ba   : > { %v408_v6 = vadd.f32 %v722_v57, %v407_v4 }
 0x1bc   : > { %439 = vperm.xlu2 %702, %v421_v5   ;;  %v412_v11 = vsel %vm411_vm10, %v722_v57, %v408_v6 }
 0x1bd   : > { %v417_v13 = vsel %vm414_vm11, %v416_v12, %v412_v11 }
 0x1be   : > { %v422_v25 = vsub.f32 1.0, %v417_v13 }
 0x1bf   : > { %v724_v9 = vpop.eup %723 }
 0x1c0   : > { %v356_v10 = vadd.f32 1.0, %v724_v9 }
 0x1c2   : > { %725 = vrcp.f32 %v356_v10  ;;  %v385_v17 = vand.u32 2147483648, %v356_v10  ;;  %v383_v19 = vand.u32 2147483647, %v356_v10  ;;  %vm379_vm13 = vweird.f32 %v356_v10 }
 0x1c4   : > { %468 = vperm.xlu2 %702, %v417_v13   ;;  %v386_v21 = vor.u32 1.1754944e-38, %v385_v17  ;;  %vm384_vm15 = vcmp.eq.f32.partialorder %v383_v19, 8.507059e+37 }
 0x1c8   : > { %v726_v14 = vpop.eup %725 }
 0x1c9   : > { %v375_v15 = vmul.f32 %v726_v14, %v356_v10  ;;  %vm380_vm12 = vweird.f32 %v726_v14 }
 0x1ca   : > { %vm381_vm14 = vmor %vm379_vm13, %vm380_vm12 }
 0x1cb   : > { %v376_v16 = vsub.f32 1.0, %v375_v15 }
 0x1cd   : > { %v377_v18 = vmul.f32 %v726_v14, %v376_v16 }
 0x1cf   : > { %v378_v20 = vadd.f32 %v726_v14, %v377_v18 }
 0x1d1   : > { %v382_v22 = vsel %vm381_vm14, %v726_v14, %v378_v20 }
 0x1d2   : > { %v387_v23 = vsel %vm384_vm15, %v386_v21, %v382_v22 }
 0x1d3   : > { %458 = vperm.xlu0 %703, %v387_v23   ;;  %v420_v24 = vsub.f32 1.0, %v387_v23 }
 0x1d5   : > { %434 = vperm.xlu1 %704, %v420_v24  }
 0x1dd   : > { %444 = vperm.xlu1 %704, %v422_v25  }
 0x1e5   : > { %463 = vperm.xlu1 %704, %v402_v3  }
 0x20e   : > { %v454_v29 = vpop.permute.xlu2 %453 }
 0x216   : > { %v440_v32 = vpop.permute.xlu2 %439 }
 0x217   : > { %v449_v41 = vsel %vm426_vm1, %v440_v32, 0.0 }
 0x21e   : > { %v469_v38 = vpop.permute.xlu2 %468 }
 0x228   : > { %v430_v28 = vpop.permute.xlu0 %429 }
 0x229   : > { %v447_v30 = vsel %vm426_vm1, %v430_v28, 0.0 }
 0x22a   : > { %v471_v31 = vsel %vm425_vm0, %v454_v29, %v447_v30 }
 0x22b   : > { %475 = vst [vmem:[%s154_s8] sm:$0xff] %v471_v31 }
 0x245   : > { %v459_v34 = vpop.permute.xlu0 %458 }
 0x247   : > { %v435_v33 = vpop.permute.xlu1 %434 }
 0x248   : > { %v448_v35 = vsel %vm426_vm1, %v435_v33, 0.0 }
 0x249   : > { %v472_v36 = vsel %vm425_vm0, %v459_v34, %v448_v35 }
 0x24a   : > { %476 = vst [vmem:[%s154_s8 + $0x8] sm:$0xff] %v472_v36 }
 0x24f   : > { %v445_v37 = vpop.permute.xlu1 %444 }
 0x250   : > { %v450_v39 = vsel %vm426_vm1, %v445_v37, 0.0 }
 0x251   : > { %v474_v40 = vsel %vm425_vm0, %v469_v38, %v450_v39 }
 0x252   : > { %478 = vst [vmem:[%s154_s8 + $0x18] sm:$0xff] %v474_v40 }
 0x257   : > { %v464_v42 = vpop.permute.xlu1 %463 }
 0x258   : > { %v473_v43 = vsel %vm425_vm0, %v464_v42, %v449_v41 }
 0x259   : > { %477 = vst [vmem:[%s154_s8 + $0x10] sm:$0xff] %v473_v43 }
 0x25a   : > { %784 = shalt.err (!%p781_p8)
}
 0x25b   : > { %s833_s3 = smov 128   ;;  %s834_s4 = smov 8  }
 0x25c   : > { %636 = dma.vmem_to_hbm [thread:$0]  (%p888_p5), %s493_s22, 512, %s495_s23, %s480_s13, %s833_s3, %s833_s3, %s834_s4  }
 0x25d PF: > { %p648_p9 = scmp.ge.s32.totalorder %s823_s12, 2  ;;  %s509_s5 = sand.u32 1, %s811_s9  }
 0x25e   : > { %s510_s6 = scalar_lea.sflag [#allocation4], %s509_s5 }
 0x25f   : > { %p643_p10 = pnand %p648_p9, %p892_p6 }
 0x261   : > { %p644_p11 = pneg %p643_p10 }
 0x263   : > { %806 = dma.done.wait (%p644_p11), %s510_s6, 512  }
 0x264   : > { %808 = vsyncadd (%p644_p11), %s510_s6, 4294966784  ;;  %p13_p12 = scmp.ge.s32.totalorder %s875_s15, 4   ;;  %s961_s9 = smov %s815_s10 }
 0x265   : > { %s962_s10 = smov %s819_s11  ;;  %s963_s11 = smov %s886_s18 }
 0x266   : > { %s964_s12 = smov %s875_s15  ;;  %15 = sbr.rel (!%p13_p12) target bundleno = 4 (0x4), region = 68 }
 0x26b   :  { %516 = vsyncpa [#allocation3], 1 }
 0x26c   :  { %518 = vsyncpa [#allocation3 + $0x1], 1 }
 0x26d   :  { %519 = vsyncpa [#allocation4], 1 }
 0x26e   :  { %521 = vsyncpa [#allocation4 + $0x1], 1 }

</bundles_post_ra>
